<compile_context>
chip_gen: v5e
topology: v5e:2x2
jax: 0.10.0
libtpu: 0.0.40
codegen_flags: <defaults>
</compile_context>

<pallas_src>
import functools

import jax
import jax.numpy as jnp
from jax import lax
from jax.experimental import pallas as pl
from jax.experimental.pallas import tpu as pltpu


# ---------------------------------------------------------------------------
# Per-chip VMEM budget
# ---------------------------------------------------------------------------
@functools.lru_cache(maxsize=None)
def _vmem_limit_bytes():
    """~75% of this chip's physical VMEM (v5e/v6e ~96 MiB, v7x ~48 MiB)."""
    cap = 64 * 1024 * 1024  # conservative fallback (v7x-sized physical VMEM)
    try:
        info = pltpu.get_tpu_info()
        cap = int(getattr(info, "vmem_capacity_bytes", cap) or cap)
    except Exception:
        pass
    return int(cap * 3 // 4)


def _tile_budget_bytes():
    # Headroom under the compiler limit for Mosaic-internal scratch/temps.
    return int(_vmem_limit_bytes() * 6 // 10)


def _aligned_divisors(dim, align):
    """Divisors of `dim` that are multiples of `align`, largest first.

    Falls back to [dim]: a full-extent block is always layout-legal even when
    the dim is not a multiple of the alignment.
    """
    divs = [d for d in range(align, dim + 1, align) if dim % d == 0]
    if not divs:
        return [dim]
    return sorted(divs, reverse=True)


# ---------------------------------------------------------------------------
# NN matmul:  out = x @ A      (x: (M, K), A: (K, N))
# Used for forward (with the pre-transposed A_T) and adjoint (with A).
# ---------------------------------------------------------------------------
def _choose_mm_tiles(M, K, N, x_itemsize, a_itemsize, o_itemsize, budget):
    """Largest aligned-divisor tiles whose double-buffered blocks fit `budget`.

    Small problems collapse to a single grid step (whole operator in VMEM).
    """
    tm_opts = _aligned_divisors(M, 8)
    tk_opts = _aligned_divisors(K, 128)
    tn_opts = _aligned_divisors(N, 128)

    def vmem_bytes(tm, tk, tn):
        return (2 * tm * tk * x_itemsize      # x blocks, double-buffered
                + 2 * tk * tn * a_itemsize    # A blocks, double-buffered
                + 2 * tm * tn * o_itemsize    # output blocks
                + tm * tn * 4)                # f32 accumulator (worst case)

    for tm in tm_opts:
        for tn in tn_opts:
            for tk in tk_opts:
                if vmem_bytes(tm, tk, tn) <= budget:
                    return tm, tk, tn
    return tm_opts[-1], tk_opts[-1], tn_opts[-1]


def _mm_nn_kernel_accout(x_ref, a_ref, o_ref):
    """f32 output: accumulate directly into the resident output block."""
    @pl.when(pl.program_id(2) == 0)
    def _init():
        o_ref[...] = jnp.zeros_like(o_ref)

    # In-kernel cast of x to bf16 (A is stored bf16); f32 MXU accumulation.
    o_ref[...] += jnp.dot(
        x_ref[...].astype(jnp.bfloat16), a_ref[...],
        preferred_element_type=jnp.float32,
    )


def _mm_nn_kernel_scratch(x_ref, a_ref, o_ref, acc_ref):
    """Non-f32 output: f32 VMEM accumulator, single cast at the last K step."""
    @pl.when(pl.program_id(2) == 0)
    def _init():
        acc_ref[...] = jnp.zeros_like(acc_ref)

    acc_ref[...] += jnp.dot(
        x_ref[...].astype(jnp.bfloat16), a_ref[...],
        preferred_element_type=jnp.float32,
    )

    @pl.when(pl.program_id(2) == pl.num_programs(2) - 1)
    def _finalize():
        o_ref[...] = acc_ref[...].astype(o_ref.dtype)


def matmul_nn(x, a, *, out_dtype=jnp.bfloat16):
    """Compute x @ a with a tiled Pallas TPU kernel (f32 accumulation)."""
    M, K = x.shape
    K2, N = a.shape
    assert K == K2, (x.shape, a.shape)

    out_dtype = jnp.dtype(out_dtype)
    tm, tk, tn = _choose_mm_tiles(
        M, K, N, x.dtype.itemsize, a.dtype.itemsize, out_dtype.itemsize,
        _tile_budget_bytes(),
    )
    grid = (M // tm, N // tn, K // tk)

    out_is_f32 = out_dtype == jnp.dtype(jnp.float32)
    kernel = _mm_nn_kernel_accout if out_is_f32 else _mm_nn_kernel_scratch
    scratch = [] if out_is_f32 else [pltpu.VMEM((tm, tn), jnp.float32)]

    cost = pl.CostEstimate(
        flops=2 * M * N * K,
        transcendentals=0,
        bytes_accessed=(
            grid[1] * M * K * x.dtype.itemsize      # x re-streamed per N tile
            + grid[0] * K * N * a.dtype.itemsize    # A re-streamed per M tile
            + M * N * out_dtype.itemsize
        ),
    )

    return pl.pallas_call(
        kernel,
        out_shape=jax.ShapeDtypeStruct((M, N), out_dtype),
        grid_spec=pltpu.PrefetchScalarGridSpec(
            num_scalar_prefetch=0,
            grid=grid,
            in_specs=[
                pl.BlockSpec((tm, tk), lambda i, j, k: (i, k)),
                pl.BlockSpec((tk, tn), lambda i, j, k: (k, j)),
            ],
            out_specs=pl.BlockSpec((tm, tn), lambda i, j, k: (i, j)),
            scratch_shapes=scratch,
        ),
        compiler_params=pltpu.CompilerParams(
            dimension_semantics=("parallel", "parallel", "arbitrary"),
            vmem_limit_bytes=_vmem_limit_bytes(),
        ),
        cost_estimate=cost,
    )(x, a)


# ---------------------------------------------------------------------------
# gramian (fused):  out = (x @ A^T) @ A   — single kernel, A streamed once,
# the (tm, out) intermediate never leaves VMEM.
# ---------------------------------------------------------------------------
def _choose_gramian_tiles(M, K, N, x_itemsize, a_itemsize, budget):
    tm_opts = _aligned_divisors(M, 8)
    to_opts = _aligned_divisors(N, 128)

    def vmem_bytes(tm, to):
        return (2 * tm * K * x_itemsize   # x blocks, double-buffered
                + 2 * to * K * a_itemsize  # A tiles, double-buffered
                + 2 * tm * K * 4           # resident f32 output blocks
                + tm * to * 4              # intermediate t (f32)
                + to * K * 4)              # f32 upcast of the A tile (2nd dot)

    # Prefer the LARGEST A tile that still leaves >=2 grid steps along the
    # out-feature axis, so the A-tile DMA double-buffers against the MXU.
    for tm in tm_opts:
        for prefer_multi_step in (True, False):
            for to in to_opts:
                if prefer_multi_step and N // to < 2:
                    continue
                if vmem_bytes(tm, to) <= budget:
                    return tm, to
    return tm_opts[-1], to_opts[-1]


def _gramian_kernel(x_ref, a_ref, o_ref):
    j = pl.program_id(1)

    @pl.when(j == 0)
    def _init():
        o_ref[...] = jnp.zeros_like(o_ref)

    a_tile = a_ref[...]                        # (to, K) bf16, reused twice
    x_tile = x_ref[...].astype(jnp.bfloat16)   # in-kernel cast (VPU, free slot)

    # t = x @ A_tile^T  -> (tm, to), f32. Contract the shared K axis directly
    # (same pattern as flash-attention q @ k^T); no transposed copy of A.
    t = lax.dot_general(
        x_tile, a_tile,
        dimension_numbers=(((1,), (1,)), ((), ())),
        preferred_element_type=jnp.float32,
    )
    # out += t @ A_tile -> (tm, K); t kept in f32 (intentional: better accuracy
    # than the bf16-quantized compositional path, and compute is slack here).
    o_ref[...] += jnp.dot(
        t, a_tile.astype(jnp.float32), preferred_element_type=jnp.float32
    )


def gramian_fused(x, a):
    """Compute (x @ a.T) @ a in one Pallas kernel. Output is float32."""
    M, K = x.shape
    N, K2 = a.shape
    assert K == K2, (x.shape, a.shape)

    tm, to = _choose_gramian_tiles(
        M, K, N, x.dtype.itemsize, a.dtype.itemsize, _tile_budget_bytes()
    )
    grid = (M // tm, N // to)

    cost = pl.CostEstimate(
        flops=4 * M * N * K,
        transcendentals=0,
        bytes_accessed=(
            M * K * x.dtype.itemsize                # x streamed once per M tile
            + grid[0] * N * K * a.dtype.itemsize    # A re-streamed per M tile
            + M * K * 4
        ),
    )

    return pl.pallas_call(
        _gramian_kernel,
        out_shape=jax.ShapeDtypeStruct((M, K), jnp.float32),
        grid_spec=pltpu.PrefetchScalarGridSpec(
            num_scalar_prefetch=0,
            grid=grid,
            in_specs=[
                pl.BlockSpec((tm, K), lambda i, j: (i, 0)),   # x block (resident over j)
                pl.BlockSpec((to, K), lambda i, j: (j, 0)),   # stream A tiles
            ],
            out_specs=pl.BlockSpec((tm, K), lambda i, j: (i, 0)),
        ),
        compiler_params=pltpu.CompilerParams(
            dimension_semantics=("parallel", "arbitrary"),
            vmem_limit_bytes=_vmem_limit_bytes(),
        ),
        cost_estimate=cost,
    )(x, a)


# ---------------------------------------------------------------------------
# Operator
# ---------------------------------------------------------------------------
class LinearOperator:
    """Concrete dense linear operator backed by Pallas TPU matmul kernels."""

    def __init__(self, out_features, in_features, key):
        a_f32 = jax.random.normal(
            key, (out_features, in_features), dtype=jnp.float32
        ) / jnp.sqrt(jnp.float32(in_features))
        # bf16 operator storage: halves HBM streaming of A (the bottleneck at
        # small batch); all matmuls accumulate in f32 on the MXU.
        self.A = a_f32.astype(jnp.bfloat16)            # (out, in)
        # Pre-transposed static copy so forward is a plain NN matmul
        # (no per-tile transpose on the hot path). Cheap: A is read many times.
        self.A_T = jnp.asarray(self.A.T)               # (in, out)

    def forward(self, x):
        # (B, in) @ A^T -> (B, out); bf16 output keeps the writeback lane-dense
        # and halves output bytes. x is cast to bf16 inside the kernel.
        return matmul_nn(x, self.A_T, out_dtype=jnp.bfloat16)

    def adjoint(self, y):
        # (B, out) @ A -> (B, in)
        return matmul_nn(y, self.A, out_dtype=jnp.bfloat16)

    def gramian(self, x):
        # adjoint(forward(x)) fused into a single kernel; f32 output.
        return gramian_fused(x, self.A)

    def beforehand(self, x):
        # TODO(synk): abstract in the reference module (body is `pass`).
        return None


if __name__ == "__main__":
    key = jax.random.PRNGKey(0)
    k_x, k_a = jax.random.split(key)

    # NOTE: with batch=8 the MXU is a few % utilized by construction; the
    # kernels are A-bandwidth / overhead-bound, hence bf16 A, single-step
    # forward/adjoint grids, and the fused single-stream gramian.
    batch, in_features, out_features = 8, 384, 512
    x = jax.random.normal(k_x, (batch, in_features), dtype=jnp.float32)

    op = LinearOperator(out_features, in_features, k_a)

    y = op.forward(x)        # (8, 512) bf16
    z = op.adjoint(y)        # (8, 384) bf16  == gramian via composition
    g = op.gramian(x)        # (8, 384) f32   fused single-kernel gramian
    jax.block_until_ready((y, z, g))

    assert y.shape == (batch, out_features)
    assert z.shape == (batch, in_features)
    assert g.shape == (batch, in_features)

    # References mirror kernel numerics: bf16 operands, f32 accumulation.
    xb = x.astype(jnp.bfloat16)
    a = op.A
    y_ref = jnp.dot(xb, op.A_T, preferred_element_type=jnp.float32)
    z_ref = jnp.dot(y, a, preferred_element_type=jnp.float32)
    # Fused gramian keeps the intermediate in f32 (documented choice).
    g_ref = jnp.dot(y_ref, a.astype(jnp.float32),
                    preferred_element_type=jnp.float32)

    assert jnp.allclose(y.astype(jnp.float32), y_ref, atol=2e-2, rtol=2e-2)
    assert jnp.allclose(z.astype(jnp.float32), z_ref, atol=2e-2, rtol=2e-2)
    assert jnp.allclose(g, g_ref, atol=5e-2, rtol=5e-2)
    # Fused gramian matches the compositional definition adjoint(forward(x))
    # up to the bf16 quantization of the intermediate/output in the latter.
    assert jnp.allclose(g, z.astype(jnp.float32), atol=1e-1, rtol=1e-1)

    print("KERNEL_OK")
</pallas_src>

<mosaic_0001>
module attributes {stable_mosaic.version = 11 : i64} {
  func.func @_mm_nn_kernel_scratch(%arg0: i32, %arg1: i32, %arg2: i32, %arg3: memref<8x384xf32, #tpu.memory_space<vmem>>, %arg4: memref<384x512xbf16, #tpu.memory_space<vmem>>, %arg5: memref<8x512xbf16, #tpu.memory_space<vmem>>, %arg6: memref<8x512xf32, #tpu.memory_space<vmem>>) attributes {dimension_semantics = [#tpu.dimension_semantics<parallel>, #tpu.dimension_semantics<parallel>, #tpu.dimension_semantics<arbitrary>], iteration_bounds = array<i64: 1, 1, 1>, scalar_prefetch = 0 : i64, scratch_operands = 1 : i64, tpu.core_type = #tpu.core_type<tc>, window_params = [{transform_indices = @transform_0, window_bounds = array<i64: 8, 384>}, {transform_indices = @transform_1, window_bounds = array<i64: 384, 512>}, {transform_indices = @transform_2, window_bounds = array<i64: 8, 512>}]} {
    %c0_i32 = arith.constant 0 : i32
    %0 = arith.cmpi eq, %arg2, %c0_i32 : i32
    %1 = arith.extui %0 : i1 to i32
    %c0_i32_0 = arith.constant 0 : i32
    %2 = arith.cmpi ne, %1, %c0_i32_0 : i32
    scf.if %2 {
      %cst_10 = arith.constant 0.000000e+00 : f32
      %13 = vector.broadcast %cst_10 : f32 to vector<8x512xf32>
      %c0_11 = arith.constant 0 : index
      %c0_12 = arith.constant 0 : index
      %14 = vector.load %arg6[%c0_11, %c0_12] : memref<8x512xf32, #tpu.memory_space<vmem>>, vector<8x512xf32>
      tpu.vector_store %arg6[%c0_11, %c0_12], %13 {strides = array<i32>} : memref<8x512xf32, #tpu.memory_space<vmem>>, vector<8x512xf32>,
    } else {
    }
    %c0 = arith.constant 0 : index
    %c0_1 = arith.constant 0 : index
    %3 = vector.load %arg6[%c0, %c0_1] : memref<8x512xf32, #tpu.memory_space<vmem>>, vector<8x512xf32>
    %c0_2 = arith.constant 0 : index
    %c0_3 = arith.constant 0 : index
    %4 = vector.load %arg3[%c0_2, %c0_3] : memref<8x384xf32, #tpu.memory_space<vmem>>, vector<8x384xf32>
    %5 = arith.truncf %4 : vector<8x384xf32> to vector<8x384xbf16>
    %c0_4 = arith.constant 0 : index
    %c0_5 = arith.constant 0 : index
    %6 = vector.load %arg4[%c0_4, %c0_5] : memref<384x512xbf16, #tpu.memory_space<vmem>>, vector<384x512xbf16>
    %cst = arith.constant dense<0.000000e+00> : vector<8x512xf32>
    %7 = tpu.matmul %5, %6, %cst {dimension_numbers = #tpu.dot_dimension_numbers<[1], [0], [0], [1], [0, 0, 1, 1], [], []>} : vector<8x384xbf16>, vector<384x512xbf16>, vector<8x512xf32> -> vector<8x512xf32>
    %8 = arith.addf %3, %7 : vector<8x512xf32>
    %c0_6 = arith.constant 0 : index
    %c0_7 = arith.constant 0 : index
    %9 = vector.load %arg6[%c0_6, %c0_7] : memref<8x512xf32, #tpu.memory_space<vmem>>, vector<8x512xf32>
    tpu.vector_store %arg6[%c0_6, %c0_7], %8 {strides = array<i32>} : memref<8x512xf32, #tpu.memory_space<vmem>>, vector<8x512xf32>,
    %c0_i32_8 = arith.constant 0 : i32
    %10 = arith.cmpi eq, %arg2, %c0_i32_8 : i32
    %11 = arith.extui %10 : i1 to i32
    %c0_i32_9 = arith.constant 0 : i32
    %12 = arith.cmpi ne, %11, %c0_i32_9 : i32
    scf.if %12 {
      %c0_10 = arith.constant 0 : index
      %c0_11 = arith.constant 0 : index
      %13 = vector.load %arg6[%c0_10, %c0_11] : memref<8x512xf32, #tpu.memory_space<vmem>>, vector<8x512xf32>
      %14 = arith.truncf %13 : vector<8x512xf32> to vector<8x512xbf16>
      %c0_12 = arith.constant 0 : index
      %c0_13 = arith.constant 0 : index
      %15 = vector.load %arg5[%c0_12, %c0_13] : memref<8x512xbf16, #tpu.memory_space<vmem>>, vector<8x512xbf16>
      tpu.vector_store %arg5[%c0_12, %c0_13], %14 {strides = array<i32>} : memref<8x512xbf16, #tpu.memory_space<vmem>>, vector<8x512xbf16>,
    } else {
    }
    return
  }
  func.func @transform_0(%arg0: i32, %arg1: i32, %arg2: i32) -> (i32, i32) {
    %c0_i32 = arith.constant 0 : i32
    return %arg0, %arg2 : i32, i32
  }
  func.func @transform_1(%arg0: i32, %arg1: i32, %arg2: i32) -> (i32, i32) {
    %c0_i32 = arith.constant 0 : i32
    return %arg2, %arg1 : i32, i32
  }
  func.func @transform_2(%arg0: i32, %arg1: i32, %arg2: i32) -> (i32, i32) {
    %c0_i32 = arith.constant 0 : i32
    return %arg0, %arg1 : i32, i32
  }
}

</mosaic_0001>

<bundles_post_ra>
// kernel: tpu_custom_call.1
= control target key start
LH: loop header
LB: loop body
LE: loop exit
PB: predicated region body
PF: predicated region fallthrough
CT: control target
= control target key end

     0   :  { %7 = vsyncpa [#allocation4], 0  ;;  %s1439_s0 = inlined_call_operand.hbm [shape: f32[8,384], index: 0, kind: input, shape index: {}]   ;;  %s1440_s1 = inlined_call_operand.hbm [shape: bf16[384,512], index: 1, kind: input, shape index: {}]   ;;  %s1441_s2 = inlined_call_operand.hbm [shape: bf16[8,512], index: 2, kind: output, shape index: {}]  }
   0x1   :  { %8 = vsyncpa [#allocation7], 0 }
   0x2   :  { %9 = vsyncpa [#allocation5], 0  ;;  %s15_s11 = sshll.u32 %s1439_s0, 4  ;;  %s1392_s12 = smov [#allocation3]   ;;  %s16_s11 = int_to_ptr.hbm [resolvable:$true] %s15_s11 }
   0x3   :  { %s17_s13 = sshll.u32 %s1392_s12, 4  ;;  %s25_s16 = sshll.u32 %s1440_s1, 4  ;;  %s18_s13 = int_to_ptr.vmem [resolvable:$true] %s17_s13  ;;  %s26_s16 = int_to_ptr.hbm [resolvable:$true] %s25_s16 }
   0x4   :  { %20 = dma.hbm_to_vmem [thread:$0]  %s16_s11, 384, %s18_s13, [#allocation4]  }
   0x5   :  { %s1393_s17 = smov [#allocation6]   ;;  %s1394_s19 = smov 256  }
   0x6   :  { %s27_s18 = sshll.u32 %s1393_s17, 4  ;;  %s1395_s20 = smov 16   ;;  %s28_s18 = int_to_ptr.vmem [resolvable:$true] %s27_s18 }
   0x7   :  { %33 = dma.hbm_to_vmem [thread:$0]  %s26_s16, 12288, %s28_s18, [#allocation7], %s1394_s19, %s1394_s19, %s1395_s20  }
   0x8   :  { %1386 = dma.done.wait [#allocation4], 384  }
   0x9   :  { %1387 = vsyncadd [#allocation4], 4294966912 }
   0xa   :  { %1388 = dma.done.wait [#allocation7], 12288  }
   0xb   :  { %1389 = vsyncadd [#allocation7], 4294955008  ;;  %v943_v0 = vld [vmem:[#allocation6 + $0xe0] sm:$0xf]  ;;  %v1243_v1 = vld [vmem:[#allocation6 + $0xec] sm:$0xf0] }
   0xc   :  { %v1071_v2 = vld [vmem:[#allocation6 + $0x1e0] sm:$0xf]  ;;  %v944_v3 = vor.u32 %v1243_v1, %v943_v0  ;;  %v1275_v4 = vld [vmem:[#allocation6 + $0x1ec] sm:$0xf0]  ;;  %v1241_v9 = vld [vmem:[#allocation6 + $0xe4] sm:$0xf] }
   0xd   :  { %v1199_v5 = vld [vmem:[#allocation6 + $0x2e0] sm:$0xf]  ;;  %v1307_v6 = vld [vmem:[#allocation6 + $0x2ec] sm:$0xf0]  ;;  %v1072_v7 = vor.u32 %v1275_v4, %v1071_v2  ;;  %v945_v10 = vld [vmem:[#allocation6 + $0xf0] sm:$0xf0] }
   0xe   :  { %v1200_v8 = vor.u32 %v1307_v6, %v1199_v5  ;;  %v927_v11 = vld [vmem:[#allocation6 + $0xc0] sm:$0xf]  ;;  %636 = vmatpush.bf16.msra.mxu0 %v944_v3  ;;  %v948_v12 = vor.u32 %v1241_v9, %v945_v10  ;;  %v1239_v13 = vld [vmem:[#allocation6 + $0xcc] sm:$0xf0]  ;;  %v1237_v20 = vld [vmem:[#allocation6 + $0xc4] sm:$0xf] }
   0xf   :  { %v1055_v14 = vld [vmem:[#allocation6 + $0x1c0] sm:$0xf]  ;;  %v1271_v15 = vld [vmem:[#allocation6 + $0x1cc] sm:$0xf0]  ;;  %649 = vmatpush.bf16.msra.mxu1 %v1072_v7  ;;  %v928_v16 = vor.u32 %v1239_v13, %v927_v11  ;;  %v929_v22 = vld [vmem:[#allocation6 + $0xd0] sm:$0xf0] }
  0x10   :  { %662 = vmatpush.bf16.msra.mxu2 %v1200_v8  ;;  %v1056_v17 = vor.u32 %v1271_v15, %v1055_v14  ;;  %v1183_v18 = vld [vmem:[#allocation6 + $0x2c0] sm:$0xf]  ;;  %v1303_v19 = vld [vmem:[#allocation6 + $0x2cc] sm:$0xf0]  ;;  %675 = vmatpush.bf16.msra.mxu3 %v948_v12  ;;  %v932_v25 = vor.u32 %v1237_v20, %v929_v22  ;;  %v1233_v31 = vld [vmem:[#allocation6 + $0xa4] sm:$0xf] }
  0x11   :  { %v1184_v21 = vor.u32 %v1303_v19, %v1183_v18  ;;  %v911_v23 = vld [vmem:[#allocation6 + $0xa0] sm:$0xf]  ;;  %v1235_v24 = vld [vmem:[#allocation6 + $0xac] sm:$0xf0]  ;;  %v913_v32 = vld [vmem:[#allocation6 + $0xb0] sm:$0xf0] }
  0x12   :  { %v1039_v26 = vld [vmem:[#allocation6 + $0x1a0] sm:$0xf]  ;;  %v1267_v27 = vld [vmem:[#allocation6 + $0x1ac] sm:$0xf0]  ;;  %637 = vmatpush.bf16.msra.mxu0 %v928_v16  ;;  %v912_v29 = vor.u32 %v1235_v24, %v911_v23  ;;  %v916_v38 = vor.u32 %v1233_v31, %v913_v32  ;;  %v1229_v42 = vld [vmem:[#allocation6 + $0x84] sm:$0xf] }
  0x13   :  { %v1167_v28 = vld [vmem:[#allocation6 + $0x2a0] sm:$0xf]  ;;  %v1299_v30 = vld [vmem:[#allocation6 + $0x2ac] sm:$0xf0]  ;;  %650 = vmatpush.bf16.msra.mxu1 %v1056_v17  ;;  %v1040_v33 = vor.u32 %v1267_v27, %v1039_v26  ;;  %v897_v43 = vld [vmem:[#allocation6 + $0x90] sm:$0xf0] }
  0x14   :  { %663 = vmatpush.bf16.msra.mxu2 %v1184_v21  ;;  %v1168_v34 = vor.u32 %v1299_v30, %v1167_v28  ;;  %v895_v35 = vld [vmem:[#allocation6 + $0x80] sm:$0xf]  ;;  %v1231_v36 = vld [vmem:[#allocation6 + $0x8c] sm:$0xf0]  ;;  %676 = vmatpush.bf16.msra.mxu3 %v932_v25  ;;  %v900_v50 = vor.u32 %v1229_v42, %v897_v43  ;;  %v1225_v54 = vld [vmem:[#allocation6 + $0x64] sm:$0xf] }
  0x15   :  { %v1023_v37 = vld [vmem:[#allocation6 + $0x180] sm:$0xf]  ;;  %v1263_v39 = vld [vmem:[#allocation6 + $0x18c] sm:$0xf0]  ;;  %v896_v44 = vor.u32 %v1231_v36, %v895_v35  ;;  %v881_v55 = vld [vmem:[#allocation6 + $0x70] sm:$0xf0] }
  0x16   :  { %v1151_v40 = vld [vmem:[#allocation6 + $0x280] sm:$0xf]  ;;  %v1295_v41 = vld [vmem:[#allocation6 + $0x28c] sm:$0xf0]  ;;  %638 = vmatpush.bf16.msra.mxu0 %v912_v29  ;;  %v1024_v45 = vor.u32 %v1263_v39, %v1023_v37  ;;  %v884_v62 = vor.u32 %v1225_v54, %v881_v55  ;;  %v1221_v2 = vld [vmem:[#allocation6 + $0x44] sm:$0xf] }
  0x17   :  { %651 = vmatpush.bf16.msra.mxu1 %v1040_v33  ;;  %v1152_v46 = vor.u32 %v1295_v41, %v1151_v40  ;;  %v879_v47 = vld [vmem:[#allocation6 + $0x60] sm:$0xf]  ;;  %v1227_v48 = vld [vmem:[#allocation6 + $0x6c] sm:$0xf0]  ;;  %v865_v3 = vld [vmem:[#allocation6 + $0x50] sm:$0xf0] }
  0x18   :  { %664 = vmatpush.bf16.msra.mxu2 %v1168_v34  ;;  %v1007_v49 = vld [vmem:[#allocation6 + $0x160] sm:$0xf]  ;;  %677 = vmatpush.bf16.msra.mxu3 %v916_v38  ;;  %v1259_v51 = vld [vmem:[#allocation6 + $0x16c] sm:$0xf0]  ;;  %v880_v56 = vor.u32 %v1227_v48, %v879_v47  ;;  %v868_v10 = vor.u32 %v1221_v2, %v865_v3  ;;  %v1217_v14 = vld [vmem:[#allocation6 + $0x24] sm:$0xf] }
  0x19   :  { %v1135_v52 = vld [vmem:[#allocation6 + $0x260] sm:$0xf]  ;;  %v1291_v53 = vld [vmem:[#allocation6 + $0x26c] sm:$0xf0]  ;;  %v1008_v57 = vor.u32 %v1259_v51, %v1007_v49  ;;  %v849_v15 = vld [vmem:[#allocation6 + $0x30] sm:$0xf0] }
  0x1a   :  { %639 = vmatpush.bf16.msra.mxu0 %v896_v44  ;;  %v1136_v58 = vor.u32 %v1291_v53, %v1135_v52  ;;  %v863_v59 = vld [vmem:[#allocation6 + $0x40] sm:$0xf]  ;;  %v1223_v60 = vld [vmem:[#allocation6 + $0x4c] sm:$0xf0]  ;;  %v852_v24 = vor.u32 %v1217_v14, %v849_v15  ;;  %v1213_v26 = vld [vmem:[#allocation6 + $0x4] sm:$0xf] }
  0x1b   :  { %652 = vmatpush.bf16.msra.mxu1 %v1024_v45  ;;  %v991_v61 = vld [vmem:[#allocation6 + $0x140] sm:$0xf]  ;;  %v1255_v63 = vld [vmem:[#allocation6 + $0x14c] sm:$0xf0]  ;;  %v864_v4 = vor.u32 %v1223_v60, %v863_v59  ;;  %v833_v27 = vld [vmem:[#allocation6 + $0x10] sm:$0xf0] }
  0x1c   :  { %665 = vmatpush.bf16.msra.mxu2 %v1152_v46  ;;  %678 = vmatpush.bf16.msra.mxu3 %v900_v50  ;;  %v1119_v0 = vld [vmem:[#allocation6 + $0x240] sm:$0xf]  ;;  %v1287_v1 = vld [vmem:[#allocation6 + $0x24c] sm:$0xf0]  ;;  %v992_v5 = vor.u32 %v1255_v63, %v991_v61  ;;  %v1273_v28 = vld [vmem:[#allocation6 + $0x1e4] sm:$0xf]  ;;  %v836_v39 = vor.u32 %v1213_v26, %v833_v27 }
  0x1d   :  { %v1120_v6 = vor.u32 %v1287_v1, %v1119_v0  ;;  %v847_v7 = vld [vmem:[#allocation6 + $0x20] sm:$0xf]  ;;  %v1219_v8 = vld [vmem:[#allocation6 + $0x2c] sm:$0xf0]  ;;  %v1073_v29 = vld [vmem:[#allocation6 + $0x1f0] sm:$0xf0] }
  0x1e   :  { %640 = vmatpush.bf16.msra.mxu0 %v880_v56  ;;  %v975_v9 = vld [vmem:[#allocation6 + $0x120] sm:$0xf]  ;;  %v1251_v11 = vld [vmem:[#allocation6 + $0x12c] sm:$0xf0]  ;;  %v848_v16 = vor.u32 %v1219_v8, %v847_v7  ;;  %v1305_v30 = vld [vmem:[#allocation6 + $0x2e4] sm:$0xf]  ;;  %v1076_v40 = vor.u32 %v1273_v28, %v1073_v29 }
  0x1f   :  { %653 = vmatpush.bf16.msra.mxu1 %v1008_v57  ;;  %v1103_v12 = vld [vmem:[#allocation6 + $0x220] sm:$0xf]  ;;  %v1283_v13 = vld [vmem:[#allocation6 + $0x22c] sm:$0xf0]  ;;  %v976_v19 = vor.u32 %v1251_v11, %v975_v9  ;;  %v1201_v32 = vld [vmem:[#allocation6 + $0x2f0] sm:$0xf0] }
  0x20   :  { %666 = vmatpush.bf16.msra.mxu2 %v1136_v58  ;;  %679 = vmatpush.bf16.msra.mxu3 %v884_v62  ;;  %v831_v17 = vld [vmem:[#allocation6] sm:$0xf]  ;;  %v1215_v18 = vld [vmem:[#allocation6 + $0xc] sm:$0xf0]  ;;  %v1104_v20 = vor.u32 %v1283_v13, %v1103_v12  ;;  %v951_v33 = vld [vmem:[#allocation6 + $0xe8] sm:$0xf]  ;;  %v1204_v41 = vor.u32 %v1305_v30, %v1201_v32 }
  0x21   :  { %v959_v21 = vld [vmem:[#allocation6 + $0x100] sm:$0xf]  ;;  %v1247_v22 = vld [vmem:[#allocation6 + $0x10c] sm:$0xf0]  ;;  %v832_v31 = vor.u32 %v1215_v18, %v831_v17  ;;  %v1244_v34 = vld [vmem:[#allocation6 + $0xf4] sm:$0xf0] }
  0x22   :  { %641 = vmatpush.bf16.msra.mxu0 %v864_v4  ;;  %v1087_v23 = vld [vmem:[#allocation6 + $0x200] sm:$0xf]  ;;  %v1279_v25 = vld [vmem:[#allocation6 + $0x20c] sm:$0xf0]  ;;  %v960_v35 = vor.u32 %v1247_v22, %v959_v21  ;;  %v1079_v37 = vld [vmem:[#allocation6 + $0x1e8] sm:$0xf]  ;;  %v952_v42 = vor.u32 %v1244_v34, %v951_v33 }
  0x23   :  { %654 = vmatpush.bf16.msra.mxu1 %v992_v5  ;;  %v1088_v36 = vor.u32 %v1279_v25, %v1087_v23  ;;  %v1276_v38 = vld [vmem:[#allocation6 + $0x1f4] sm:$0xf0]  ;;  %v1269_v43 = vld [vmem:[#allocation6 + $0x1c4] sm:$0xf]  ;;  %v1057_v44 = vld [vmem:[#allocation6 + $0x1d0] sm:$0xf0] }
  0x24   :  { %667 = vmatpush.bf16.msra.mxu2 %v1120_v6  ;;  %680 = vmatpush.bf16.msra.mxu3 %v868_v10  ;;  %v1301_v45 = vld [vmem:[#allocation6 + $0x2c4] sm:$0xf]  ;;  %v1080_v46 = vor.u32 %v1276_v38, %v1079_v37  ;;  %v1185_v47 = vld [vmem:[#allocation6 + $0x2d0] sm:$0xf0]  ;;  %v935_v48 = vld [vmem:[#allocation6 + $0xc8] sm:$0xf]  ;;  %v1060_v53 = vor.u32 %v1269_v43, %v1057_v44 }
  0x25   :  { %v1240_v49 = vld [vmem:[#allocation6 + $0xd4] sm:$0xf0]  ;;  %v1063_v50 = vld [vmem:[#allocation6 + $0x1c8] sm:$0xf]  ;;  %v1265_v54 = vld [vmem:[#allocation6 + $0x1a4] sm:$0xf]  ;;  %v1188_v57 = vor.u32 %v1301_v45, %v1185_v47 }
  0x26   :  { %642 = vmatpush.bf16.msra.mxu0 %v848_v16  ;;  %v1272_v51 = vld [vmem:[#allocation6 + $0x1d4] sm:$0xf0]  ;;  %v54_v52 = vld [vmem:[#allocation3] sm:$0xff]  ;;  %v1041_v55 = vld [vmem:[#allocation6 + $0x1b0] sm:$0xf0]  ;;  %v936_v58 = vor.u32 %v1240_v49, %v935_v48  ;;  %s1396_s0 = smov [#allocation8]  }
  0x27   :  { %655 = vmatpush.bf16.msra.mxu1 %v976_v19  ;;  %v1418_v56 = vpack.c.bf16 %v54_v52, %v54_v52  ;;  %v1297_v59 = vld [vmem:[#allocation6 + $0x2a4] sm:$0xf]  ;;  %v1169_v60 = vld [vmem:[#allocation6 + $0x2b0] sm:$0xf0]  ;;  %v919_v61 = vld [vmem:[#allocation6 + $0xa8] sm:$0xf]  ;;  %v1064_v62 = vor.u32 %v1272_v51, %v1063_v50  ;;  %v1044_v6 = vor.u32 %v1265_v54, %v1041_v55 }
  0x28   :  { %668 = vmatpush.bf16.msra.mxu2 %v1104_v20  ;;  %681 = vmatpush.bf16.msra.mxu3 %v852_v24  ;;  %v1236_v63 = vld [vmem:[#allocation6 + $0xb4] sm:$0xf0]  ;;  %v55_v0 = vld [vmem:[#allocation3 + $0x8] sm:$0xff]  ;;  %v1047_v2 = vld [vmem:[#allocation6 + $0x1a8] sm:$0xf]  ;;  %v1172_v7 = vor.u32 %v1297_v59, %v1169_v60  ;;  %s816_s1 = sshll.u32 %s1396_s0, 4  ;;  %s817_s1 = int_to_ptr.vmem [resolvable:$true] %s816_s1 }
  0x29   :  { %v56_v1 = vld [vmem:[#allocation3 + $0x10] sm:$0xff]  ;;  %v1421_v4 = vpack.c.bf16 %v55_v0, %v55_v0  ;;  %v920_v8 = vor.u32 %v1236_v63, %v919_v61  ;;  %v1261_v9 = vld [vmem:[#allocation6 + $0x184] sm:$0xf]  ;;  %v1025_v10 = vld [vmem:[#allocation6 + $0x190] sm:$0xf0]  ;;  %s818_s23 = sshll.u32 %s1441_s2, 4  ;;  %s819_s23 = int_to_ptr.hbm [resolvable:$true] %s818_s23 }
  0x2a   :  { %643 = vmatpush.bf16.msra.mxu0 %v832_v31  ;;  %v1268_v3 = vld [vmem:[#allocation6 + $0x1b4] sm:$0xf0]  ;;  %v1423_v5 = vpack.c.bf16 %v56_v1, %v56_v1  ;;  %v1293_v11 = vld [vmem:[#allocation6 + $0x284] sm:$0xf]  ;;  %v1153_v13 = vld [vmem:[#allocation6 + $0x290] sm:$0xf0]  ;;  %v1028_v18 = vor.u32 %v1261_v9, %v1025_v10 }
  0x2b   :  { %656 = vmatpush.bf16.msra.mxu1 %v960_v35  ;;  %v1048_v12 = vor.u32 %v1268_v3, %v1047_v2  ;;  %v903_v14 = vld [vmem:[#allocation6 + $0x88] sm:$0xf]  ;;  %v1232_v15 = vld [vmem:[#allocation6 + $0x94] sm:$0xf0]  ;;  %v1156_v19 = vor.u32 %v1293_v11, %v1153_v13  ;;  %v1257_v21 = vld [vmem:[#allocation6 + $0x164] sm:$0xf] }
  0x2c   :  { %669 = vmatpush.bf16.msra.mxu2 %v1088_v36  ;;  %682 = vmatpush.bf16.msra.mxu3 %v836_v39  ;;  %v1031_v16 = vld [vmem:[#allocation6 + $0x188] sm:$0xf]  ;;  %v1264_v17 = vld [vmem:[#allocation6 + $0x194] sm:$0xf0]  ;;  %v904_v20 = vor.u32 %v1232_v15, %v903_v14  ;;  %v1009_v22 = vld [vmem:[#allocation6 + $0x170] sm:$0xf0] }
  0x2d   :  { %644 = vmatmul.bf16.vlgmr.msra.gmra.mxu0 %v1418_v56  ;;  %v1289_v23 = vld [vmem:[#allocation6 + $0x264] sm:$0xf]  ;;  %v1032_v24 = vor.u32 %v1264_v17, %v1031_v16  ;;  %v1137_v25 = vld [vmem:[#allocation6 + $0x270] sm:$0xf0]  ;;  %v887_v26 = vld [vmem:[#allocation6 + $0x68] sm:$0xf]  ;;  %v1012_v30 = vor.u32 %v1257_v21, %v1009_v22 }
  0x2e   :  { %688 = vmatpush.bf16.msrb.mxu0 %v1076_v40  ;;  %657 = vmatmul.bf16.vlgmr.msra.gmra.mxu1 %v1421_v4  ;;  %v1228_v27 = vld [vmem:[#allocation6 + $0x74] sm:$0xf0]  ;;  %v1015_v28 = vld [vmem:[#allocation6 + $0x168] sm:$0xf]  ;;  %v1140_v31 = vor.u32 %v1289_v23, %v1137_v25  ;;  %v1253_v33 = vld [vmem:[#allocation6 + $0x144] sm:$0xf] }
  0x2f   :  { %701 = vmatpush.bf16.msrb.mxu1 %v1204_v41  ;;  %683 = vmatmul.bf16.vlgmr.msra.gmra.mxu3 %v1418_v56  ;;  %v1260_v29 = vld [vmem:[#allocation6 + $0x174] sm:$0xf0]  ;;  %v888_v32 = vor.u32 %v1228_v27, %v887_v26  ;;  %v993_v34 = vld [vmem:[#allocation6 + $0x150] sm:$0xf0]  ;;  %v1285_v35 = vld [vmem:[#allocation6 + $0x244] sm:$0xf] }
  0x30   :  { %714 = vmatpush.bf16.msrb.mxu2 %v952_v42  ;;  %727 = vmatpush.bf16.msrb.mxu3 %v1080_v46  ;;  %v1016_v36 = vor.u32 %v1260_v29, %v1015_v28  ;;  %v1121_v37 = vld [vmem:[#allocation6 + $0x250] sm:$0xf0]  ;;  %v871_v38 = vld [vmem:[#allocation6 + $0x48] sm:$0xf]  ;;  %v1224_v39 = vld [vmem:[#allocation6 + $0x54] sm:$0xf0]  ;;  %v996_v42 = vor.u32 %v1253_v33, %v993_v34 }
  0x31   :  { %670 = vmatmul.bf16.vlgmr.msra.gmra.mxu2 %v1423_v5  ;;  %v999_v40 = vld [vmem:[#allocation6 + $0x148] sm:$0xf]  ;;  %v1256_v41 = vld [vmem:[#allocation6 + $0x154] sm:$0xf0]  ;;  %v1124_v43 = vor.u32 %v1285_v35, %v1121_v37  ;;  %v872_v44 = vor.u32 %v1224_v39, %v871_v38  ;;  %v1249_v45 = vld [vmem:[#allocation6 + $0x124] sm:$0xf] }
  0x32   :  { %689 = vmatpush.bf16.msrb.mxu0 %v1060_v53  ;;  %v977_v46 = vld [vmem:[#allocation6 + $0x130] sm:$0xf0]  ;;  %v1281_v47 = vld [vmem:[#allocation6 + $0x224] sm:$0xf]  ;;  %v1000_v48 = vor.u32 %v1256_v41, %v999_v40  ;;  %v855_v50 = vld [vmem:[#allocation6 + $0x28] sm:$0xf] }
  0x33   :  { %702 = vmatpush.bf16.msrb.mxu1 %v1188_v57  ;;  %v1105_v49 = vld [vmem:[#allocation6 + $0x230] sm:$0xf0]  ;;  %v1220_v51 = vld [vmem:[#allocation6 + $0x34] sm:$0xf0]  ;;  %v983_v52 = vld [vmem:[#allocation6 + $0x128] sm:$0xf]  ;;  %v980_v54 = vor.u32 %v1249_v45, %v977_v46 }
  0x34   :  { %715 = vmatpush.bf16.msrb.mxu2 %v936_v58  ;;  %728 = vmatpush.bf16.msrb.mxu3 %v1064_v62  ;;  %v1252_v53 = vld [vmem:[#allocation6 + $0x134] sm:$0xf0]  ;;  %v1245_v55 = vld [vmem:[#allocation6 + $0x104] sm:$0xf]  ;;  %v961_v57 = vld [vmem:[#allocation6 + $0x110] sm:$0xf0]  ;;  %v1108_v58 = vor.u32 %v1281_v47, %v1105_v49  ;;  %v856_v59 = vor.u32 %v1220_v51, %v855_v50 }
  0x35   :  { %v1277_v60 = vld [vmem:[#allocation6 + $0x204] sm:$0xf]  ;;  %v1089_v61 = vld [vmem:[#allocation6 + $0x210] sm:$0xf0]  ;;  %v839_v62 = vld [vmem:[#allocation6 + $0x8] sm:$0xf]  ;;  %v984_v63 = vor.u32 %v1252_v53, %v983_v52 }
  0x36   :  { %690 = vmatpush.bf16.msrb.mxu0 %v1044_v6  ;;  %v1216_v0 = vld [vmem:[#allocation6 + $0x14] sm:$0xf0]  ;;  %v967_v1 = vld [vmem:[#allocation6 + $0x108] sm:$0xf]  ;;  %v953_v9 = vld [vmem:[#allocation6 + $0xf8] sm:$0xf0] }
  0x37   :  { %703 = vmatpush.bf16.msrb.mxu1 %v1172_v7  ;;  %v1248_v2 = vld [vmem:[#allocation6 + $0x114] sm:$0xf0]  ;;  %v1207_v3 = vld [vmem:[#allocation6 + $0x2e8] sm:$0xf]  ;;  %v1242_v7 = vld [vmem:[#allocation6 + $0xec] sm:$0xf]  ;;  %v840_v13 = vor.u32 %v1216_v0, %v839_v62 }
  0x38   :  { %716 = vmatpush.bf16.msrb.mxu2 %v920_v8  ;;  %729 = vmatpush.bf16.msrb.mxu3 %v1048_v12  ;;  %v1308_v6 = vld [vmem:[#allocation6 + $0x2f4] sm:$0xf0]  ;;  %v964_v8 = vor.u32 %v1245_v55, %v961_v57  ;;  %v1274_v10 = vld [vmem:[#allocation6 + $0x1ec] sm:$0xf]  ;;  %v1081_v11 = vld [vmem:[#allocation6 + $0x1f8] sm:$0xf0]  ;;  %v1092_v12 = vor.u32 %v1277_v60, %v1089_v61  ;;  %v968_v16 = vor.u32 %v1248_v2, %v967_v1 }
  0x39   :  { %v1306_v14 = vld [vmem:[#allocation6 + $0x2ec] sm:$0xf]  ;;  %v1209_v15 = vld [vmem:[#allocation6 + $0x2f8] sm:$0xf0]  ;;  %v1208_v17 = vor.u32 %v1308_v6, %v1207_v3  ;;  %v1304_v21 = vld [vmem:[#allocation6 + $0x2d4] sm:$0xf0] }
  0x3a   :  { %691 = vmatpush.bf16.msrb.mxu0 %v1028_v18  ;;  %v956_v18 = vor.u32 %v1242_v7, %v953_v9  ;;  %v1238_v22 = vld [vmem:[#allocation6 + $0xcc] sm:$0xf]  ;;  %v1212_v23 = vor.u32 %v1306_v14, %v1209_v15  ;;  %v1065_v26 = vld [vmem:[#allocation6 + $0x1d8] sm:$0xf0]  ;;  %v1300_v33 = vld [vmem:[#allocation6 + $0x2b4] sm:$0xf0] }
  0x3b   :  { %704 = vmatpush.bf16.msrb.mxu1 %v1156_v19  ;;  %v1084_v19 = vor.u32 %v1274_v10, %v1081_v11  ;;  %v1270_v25 = vld [vmem:[#allocation6 + $0x1cc] sm:$0xf]  ;;  %v1193_v28 = vld [vmem:[#allocation6 + $0x2d8] sm:$0xf0]  ;;  %v1296_v45 = vld [vmem:[#allocation6 + $0x294] sm:$0xf0] }
  0x3c   :  { %717 = vmatpush.bf16.msrb.mxu2 %v904_v20  ;;  %730 = vmatpush.bf16.msrb.mxu3 %v1032_v24  ;;  %v1191_v20 = vld [vmem:[#allocation6 + $0x2c8] sm:$0xf]  ;;  %v937_v24 = vld [vmem:[#allocation6 + $0xd8] sm:$0xf0]  ;;  %v1302_v27 = vld [vmem:[#allocation6 + $0x2cc] sm:$0xf] }
  0x3d   :  { %v1192_v29 = vor.u32 %v1304_v21, %v1191_v20  ;;  %v1234_v34 = vld [vmem:[#allocation6 + $0xac] sm:$0xf]  ;;  %v1196_v35 = vor.u32 %v1302_v27, %v1193_v28  ;;  %v1049_v38 = vld [vmem:[#allocation6 + $0x1b8] sm:$0xf0]  ;;  %v1143_v57 = vld [vmem:[#allocation6 + $0x268] sm:$0xf] }
  0x3e   :  { %692 = vmatpush.bf16.msrb.mxu0 %v1012_v30  ;;  %v940_v30 = vor.u32 %v1238_v22, %v937_v24  ;;  %v1266_v37 = vld [vmem:[#allocation6 + $0x1ac] sm:$0xf]  ;;  %v1177_v40 = vld [vmem:[#allocation6 + $0x2b8] sm:$0xf0]  ;;  %v1127_v7 = vld [vmem:[#allocation6 + $0x248] sm:$0xf] }
  0x3f   :  { %705 = vmatpush.bf16.msrb.mxu1 %v1140_v31  ;;  %v1068_v31 = vor.u32 %v1270_v25, %v1065_v26  ;;  %v1298_v39 = vld [vmem:[#allocation6 + $0x2ac] sm:$0xf]  ;;  %v1033_v50 = vld [vmem:[#allocation6 + $0x198] sm:$0xf0]  ;;  %v1284_v20 = vld [vmem:[#allocation6 + $0x234] sm:$0xf0] }
  0x40   :  { %718 = vmatpush.bf16.msrb.mxu2 %v888_v32  ;;  %731 = vmatpush.bf16.msrb.mxu3 %v1016_v36  ;;  %v1175_v32 = vld [vmem:[#allocation6 + $0x2a8] sm:$0xf]  ;;  %v921_v36 = vld [vmem:[#allocation6 + $0xb8] sm:$0xf0]  ;;  %v1230_v46 = vld [vmem:[#allocation6 + $0x8c] sm:$0xf]  ;;  %v1180_v47 = vor.u32 %v1298_v39, %v1177_v40 }
  0x41   :  { %v1176_v41 = vor.u32 %v1300_v33, %v1175_v32  ;;  %v1262_v49 = vld [vmem:[#allocation6 + $0x18c] sm:$0xf]  ;;  %v1161_v52 = vld [vmem:[#allocation6 + $0x298] sm:$0xf0]  ;;  %v1280_v32 = vld [vmem:[#allocation6 + $0x214] sm:$0xf0] }
  0x42   :  { %693 = vmatpush.bf16.msrb.mxu0 %v996_v42  ;;  %v924_v42 = vor.u32 %v1234_v34, %v921_v36  ;;  %v1294_v51 = vld [vmem:[#allocation6 + $0x28c] sm:$0xf]  ;;  %v1036_v55 = vor.u32 %v1262_v49, %v1033_v50  ;;  %v889_v61 = vld [vmem:[#allocation6 + $0x78] sm:$0xf0] }
  0x43   :  { %706 = vmatpush.bf16.msrb.mxu1 %v1124_v43  ;;  %v1052_v43 = vor.u32 %v1266_v37, %v1049_v38  ;;  %v1164_v60 = vor.u32 %v1294_v51, %v1161_v52  ;;  %v1258_v62 = vld [vmem:[#allocation6 + $0x16c] sm:$0xf]  ;;  %v1145_v1 = vld [vmem:[#allocation6 + $0x278] sm:$0xf0] }
  0x44   :  { %719 = vmatpush.bf16.msrb.mxu2 %v872_v44  ;;  %732 = vmatpush.bf16.msrb.mxu3 %v1000_v48  ;;  %v1159_v44 = vld [vmem:[#allocation6 + $0x288] sm:$0xf]  ;;  %v905_v48 = vld [vmem:[#allocation6 + $0x98] sm:$0xf0]  ;;  %v1290_v0 = vld [vmem:[#allocation6 + $0x26c] sm:$0xf] }
  0x45   :  { %v1160_v53 = vor.u32 %v1296_v45, %v1159_v44  ;;  %v1222_v9 = vld [vmem:[#allocation6 + $0x4c] sm:$0xf]  ;;  %v1148_v10 = vor.u32 %v1290_v0, %v1145_v1  ;;  %v873_v11 = vld [vmem:[#allocation6 + $0x58] sm:$0xf0] }
  0x46   :  { %694 = vmatpush.bf16.msrb.mxu0 %v980_v54  ;;  %v908_v54 = vor.u32 %v1230_v46, %v905_v48  ;;  %v1286_v14 = vld [vmem:[#allocation6 + $0x24c] sm:$0xf]  ;;  %v1129_v15 = vld [vmem:[#allocation6 + $0x258] sm:$0xf0] }
  0x47   :  { %707 = vmatpush.bf16.msrb.mxu1 %v1108_v58  ;;  %v1292_v58 = vld [vmem:[#allocation6 + $0x274] sm:$0xf0]  ;;  %v1218_v21 = vld [vmem:[#allocation6 + $0x2c] sm:$0xf]  ;;  %v1132_v22 = vor.u32 %v1286_v14, %v1129_v15  ;;  %v985_v25 = vld [vmem:[#allocation6 + $0x138] sm:$0xf0] }
  0x48   :  { %720 = vmatpush.bf16.msrb.mxu2 %v856_v59  ;;  %733 = vmatpush.bf16.msrb.mxu3 %v984_v63  ;;  %v1226_v59 = vld [vmem:[#allocation6 + $0x6c] sm:$0xf]  ;;  %v1017_v63 = vld [vmem:[#allocation6 + $0x178] sm:$0xf0]  ;;  %v1144_v2 = vor.u32 %v1292_v58, %v1143_v57 }
  0x49   :  { %v892_v3 = vor.u32 %v1226_v59, %v889_v61  ;;  %v1020_v6 = vor.u32 %v1258_v62, %v1017_v63  ;;  %v1250_v24 = vld [vmem:[#allocation6 + $0x12c] sm:$0xf]  ;;  %v1113_v27 = vld [vmem:[#allocation6 + $0x238] sm:$0xf0] }
  0x4a   :  { %695 = vmatpush.bf16.msrb.mxu0 %v964_v8  ;;  %v1288_v8 = vld [vmem:[#allocation6 + $0x254] sm:$0xf0]  ;;  %v1282_v26 = vld [vmem:[#allocation6 + $0x22c] sm:$0xf]  ;;  %v969_v37 = vld [vmem:[#allocation6 + $0x118] sm:$0xf0] }
  0x4b   :  { %708 = vmatpush.bf16.msrb.mxu1 %v1092_v12  ;;  %v1254_v12 = vld [vmem:[#allocation6 + $0x14c] sm:$0xf]  ;;  %v1116_v34 = vor.u32 %v1282_v26, %v1113_v27  ;;  %v1097_v39 = vld [vmem:[#allocation6 + $0x218] sm:$0xf0] }
  0x4c   :  { %721 = vmatpush.bf16.msrb.mxu2 %v840_v13  ;;  %734 = vmatpush.bf16.msrb.mxu3 %v968_v16  ;;  %v1001_v13 = vld [vmem:[#allocation6 + $0x158] sm:$0xf0]  ;;  %v1128_v16 = vor.u32 %v1288_v8, %v1127_v7  ;;  %v1214_v33 = vld [vmem:[#allocation6 + $0xc] sm:$0xf] }
  0x4d   :  { %696 = vmatmul.bf16.vlgmr.msrb.gmra.mxu0 %v1421_v4  ;;  %v1246_v36 = vld [vmem:[#allocation6 + $0x10c] sm:$0xf] }
  0x4e   :  { %740 = vmatpush.bf16.msra.mxu0 %v1208_v17  ;;  %709 = vmatmul.bf16.vlgmr.msrb.gmra.mxu1 %v1423_v5  ;;  %v876_v17 = vor.u32 %v1222_v9, %v873_v11  ;;  %v1278_v38 = vld [vmem:[#allocation6 + $0x20c] sm:$0xf] }
  0x4f   :  { %753 = vmatpush.bf16.msra.mxu1 %v956_v18  ;;  %722 = vmatmul.bf16.vlgmr.msrb.gmra.mxu2 %v1418_v56  ;;  %v1004_v18 = vor.u32 %v1254_v12, %v1001_v13 }
  0x50   :  { %766 = vmatpush.bf16.msra.mxu2 %v1084_v19  ;;  %779 = vmatpush.bf16.msra.mxu3 %v1212_v23  ;;  %v1111_v19 = vld [vmem:[#allocation6 + $0x228] sm:$0xf]  ;;  %v857_v23 = vld [vmem:[#allocation6 + $0x38] sm:$0xf0] }
  0x51   :  { %735 = vmatmul.bf16.vlgmr.msrb.gmra.mxu3 %v1421_v4  ;;  %v1112_v28 = vor.u32 %v1284_v20, %v1111_v19 }
  0x52   :  { %741 = vmatpush.bf16.msra.mxu0 %v1192_v29  ;;  %v860_v29 = vor.u32 %v1218_v21, %v857_v23 }
  0x53   :  { %754 = vmatpush.bf16.msra.mxu1 %v940_v30  ;;  %v988_v30 = vor.u32 %v1250_v24, %v985_v25 }
  0x54   :  { %767 = vmatpush.bf16.msra.mxu2 %v1068_v31  ;;  %780 = vmatpush.bf16.msra.mxu3 %v1196_v35  ;;  %v1095_v31 = vld [vmem:[#allocation6 + $0x208] sm:$0xf]  ;;  %v841_v35 = vld [vmem:[#allocation6 + $0x18] sm:$0xf0] }
  0x55   :  { %v1096_v40 = vor.u32 %v1280_v32, %v1095_v31 }
  0x56   :  { %742 = vmatpush.bf16.msra.mxu0 %v1176_v41  ;;  %v844_v41 = vor.u32 %v1214_v33, %v841_v35 }
  0x57   :  { %755 = vmatpush.bf16.msra.mxu1 %v924_v42  ;;  %v972_v42 = vor.u32 %v1246_v36, %v969_v37 }
  0x58   :  { %768 = vmatpush.bf16.msra.mxu2 %v1052_v43  ;;  %781 = vmatpush.bf16.msra.mxu3 %v1180_v47  ;;  %v1100_v43 = vor.u32 %v1278_v38, %v1097_v39 }
  0x5a   :  { %743 = vmatpush.bf16.msra.mxu0 %v1160_v53 }
  0x5b   :  { %756 = vmatpush.bf16.msra.mxu1 %v908_v54 }
  0x5c   :  { %769 = vmatpush.bf16.msra.mxu2 %v1036_v55  ;;  %782 = vmatpush.bf16.msra.mxu3 %v1164_v60 }
  0x5e   :  { %744 = vmatpush.bf16.msra.mxu0 %v1144_v2 }
  0x5f   :  { %757 = vmatpush.bf16.msra.mxu1 %v892_v3 }
  0x60   :  { %770 = vmatpush.bf16.msra.mxu2 %v1020_v6  ;;  %783 = vmatpush.bf16.msra.mxu3 %v1148_v10 }
  0x62   :  { %745 = vmatpush.bf16.msra.mxu0 %v1128_v16 }
  0x63   :  { %758 = vmatpush.bf16.msra.mxu1 %v876_v17 }
  0x64   :  { %771 = vmatpush.bf16.msra.mxu2 %v1004_v18  ;;  %784 = vmatpush.bf16.msra.mxu3 %v1132_v22 }
  0x66   :  { %746 = vmatpush.bf16.msra.mxu0 %v1112_v28 }
  0x67   :  { %759 = vmatpush.bf16.msra.mxu1 %v860_v29 }
  0x68   :  { %772 = vmatpush.bf16.msra.mxu2 %v988_v30  ;;  %785 = vmatpush.bf16.msra.mxu3 %v1116_v34 }
  0x6a   :  { %747 = vmatpush.bf16.msra.mxu0 %v1096_v40 }
  0x6b   :  { %760 = vmatpush.bf16.msra.mxu1 %v844_v41 }
  0x6c   :  { %773 = vmatpush.bf16.msra.mxu2 %v972_v42  ;;  %786 = vmatpush.bf16.msra.mxu3 %v1100_v43 }
  0x6d   :  { %748 = vmatmul.bf16.vlgmr.msra.gmra.mxu0 %v1423_v5 }
  0x6e   :  { %761 = vmatmul.bf16.vlgmr.msra.gmra.mxu1 %v1418_v56 }
  0x6f   :  { %774 = vmatmul.bf16.vlgmr.msra.gmra.mxu2 %v1421_v4  ;;  %787 = vmatmul.bf16.vlgmr.msra.gmra.mxu3 %v1423_v5 }
  0xaa   :  { %v645_v44 = vpop.f32.mrf.mxu0 }
  0xab   :  { %v658_v45 = vpop.f32.mrf.mxu1 }
  0xac   :  { %v659_v52 = vadd.f32 %v658_v45, %v645_v44 }
  0xb2   :  { %v684_v46 = vpop.f32.mrf.mxu3  ;;  %v647_v47 = vpop.f32.mrf.mxu0 }
  0xb3   :  { %v660_v49 = vpop.f32.mrf.mxu1 }
  0xb4   :  { %v671_v48 = vpop.f32.mrf.mxu2 }
  0xb5   :  { %v672_v54 = vadd.f32 %v671_v48, %v659_v52 }
  0xba   :  { %v686_v50 = vpop.f32.mrf.mxu3 }
  0xbc   :  { %v673_v51 = vpop.f32.mrf.mxu2 }
  0xca   :  { %v697_v53 = vpop.f32.mrf.mxu0 }
  0xcb   :  { %v698_v55 = vadd.f32 %v697_v53, %v684_v46  ;;  %v710_v57 = vpop.f32.mrf.mxu1 }
  0xcd   :  { %v711_v58 = vadd.f32 %v710_v57, %v698_v55 }
  0xcf   :  { %v807_v59 = vpack.c.bf16 %v711_v58, %v672_v54 }
  0xd1   :  { %809 = vst [vmem:[#allocation8] sm:$0xff] %v807_v59 }
  0xd2   :  { %v723_v56 = vpop.f32.mrf.mxu2  ;;  %v699_v60 = vpop.f32.mrf.mxu0 }
  0xd3   :  { %v712_v5 = vpop.f32.mrf.mxu1 }
  0xd4   :  { %v736_v4 = vpop.f32.mrf.mxu3 }
  0xd5   :  { %v737_v2 = vadd.f32 %v736_v4, %v723_v56 }
  0xda   :  { %v725_v61 = vpop.f32.mrf.mxu2 }
  0xdc   :  { %v738_v62 = vpop.f32.mrf.mxu3 }
  0xea   :  { %v749_v63 = vpop.f32.mrf.mxu0 }
  0xeb   :  { %v762_v0 = vpop.f32.mrf.mxu1  ;;  %v750_v9 = vadd.f32 %v749_v63, %v737_v2 }
  0xf2   :  { %v775_v1 = vpop.f32.mrf.mxu2  ;;  %v788_v6 = vpop.f32.mrf.mxu3 }
  0xf3   :  { %v776_v3 = vadd.f32 %v775_v1, %v762_v0  ;;  %v751_v7 = vpop.f32.mrf.mxu0  ;;  %v764_v8 = vpop.f32.mrf.mxu1 }
  0xf5   :  { %v789_v10 = vadd.f32 %v788_v6, %v776_v3 }
  0xf7   :  { %v808_v11 = vpack.c.bf16 %v789_v10, %v750_v9 }
  0xf9   :  { %810 = vst [vmem:[#allocation8 + $0x8] sm:$0xff] %v808_v11 }
  0xfa   :  { %v777_v12 = vpop.f32.mrf.mxu2  ;;  %821 = dma.vmem_to_hbm [thread:$0]  %s817_s1, 256, %s819_s23, [#allocation5]   ;;  %v790_v13 = vpop.f32.mrf.mxu3 }
  0xfb   :  { %1390 = dma.done.wait [#allocation5], 256  }
  0xfc   :  { %1391 = vsyncadd [#allocation5], 4294967040 }
  0xfd   :  { %826 = vsyncpa [#allocation4], 1 }
  0xfe   :  { %827 = vsyncpa [#allocation7], 1 }
  0xff   :  { %828 = vsyncpa [#allocation5], 1 }

</bundles_post_ra>
